<compile_context>
chip_gen: v5e
topology: v5e:2x2
jax: 0.10.0
libtpu: 0.0.40
codegen_flags: <defaults>
</compile_context>

<pallas_src>
import jax
import jax.numpy as jnp
from jax.experimental import pallas as pl
from jax.experimental.pallas import tpu as pltpu

NEG_INF = float("-inf")


def _mvsdpa_kernel(inv_t_ref, q_ref, k_ref, v_ref, out_ref, attn_ref):
    """No-mask path. q:(TB,Dk) k:(TB,L,Dk) v:(TB,L,Dv) -> out:(TB,Dv), attn:(TB,L)."""
    inv_t = inv_t_ref[0]
    q3 = q_ref[...][:, None, :]                      # (TB, 1, Dk), native dtype
    k = k_ref[...]                                   # (TB, L, Dk)
    v = v_ref[...]                                   # (TB, L, Dv)

    # MXU batched q·kᵀ — no (TB, L, Dk) intermediate, no cross-lane reduce.
    s = jnp.einsum("bqd,bkd->bqk", q3, k,
                   preferred_element_type=jnp.float32) * inv_t      # (TB, 1, L)

    mx = jnp.max(s, axis=-1, keepdims=True)
    p = jnp.exp(s - mx)
    inv_denom = pl.reciprocal(jnp.sum(p, axis=-1, keepdims=True), approx=True)
    attn3 = p * inv_denom                                           # (TB, 1, L) f32

    out3 = jnp.einsum("bqk,bkd->bqd", attn3.astype(v.dtype), v,
                      preferred_element_type=jnp.float32)           # (TB, 1, Dv)

    out_ref[...] = out3.reshape(out_ref.shape).astype(out_ref.dtype)
    attn_ref[...] = attn3.reshape(attn_ref.shape).astype(attn_ref.dtype)


def _mvsdpa_mask_kernel(inv_t_ref, bias_ref, q_ref, k_ref, v_ref, out_ref, attn_ref):
    """Masked path. bias:(TB,L) f32 additive (0 or -inf) — no compare+select in kernel."""
    inv_t = inv_t_ref[0]
    q3 = q_ref[...][:, None, :]
    k = k_ref[...]
    v = v_ref[...]

    s = jnp.einsum("bqd,bkd->bqk", q3, k,
                   preferred_element_type=jnp.float32) * inv_t      # (TB, 1, L)
    s = s + bias_ref[...][:, None, :]

    mx = jnp.max(s, axis=-1, keepdims=True)
    p = jnp.exp(s - mx)
    inv_denom = pl.reciprocal(jnp.sum(p, axis=-1, keepdims=True), approx=True)
    attn3 = p * inv_denom

    out3 = jnp.einsum("bqk,bkd->bqd", attn3.astype(v.dtype), v,
                      preferred_element_type=jnp.float32)

    out_ref[...] = out3.reshape(out_ref.shape).astype(out_ref.dtype)
    attn_ref[...] = attn3.reshape(attn_ref.shape).astype(attn_ref.dtype)


def _round_up(x, m):
    return (x + m - 1) // m * m


def _pick_block_b(n, l, dk, dv, k_itemsize, v_itemsize,
                  cap=64, vmem_block_budget=20 * 1024 * 1024):
    """Batch-tile size: multiple of 8, VMEM-budget aware (double-buffered k+v blocks,
    counting last-dim lane padding to 128), capped at 64 so v7x (64 MiB physical /
    32 MiB scoped) and v5e stay safe, and small enough that the grid has >=2
    (ideally >=4) steps for pipelining + v7x dual-TensorCore sharding."""
    if n <= 8:
        return n
    per_row = l * (_round_up(dk, 128) * k_itemsize + _round_up(dv, 128) * v_itemsize)
    tb_vmem = max(8, (vmem_block_budget // (2 * per_row)) // 8 * 8)
    tb_grid = max(8, (n // 4) // 8 * 8)          # aim for >= 4 grid steps when N allows
    return int(max(8, min(cap, tb_vmem, tb_grid)))


def mv_scaled_dot_product_attention(q, k, v, temperature, mask=None):
    """Pallas equivalent of MatrixVectorScaledDotProductAttention.forward (eval mode).

    q: (N, d_k), k: (N, L, d_k), v: (N, L, d_v), mask: optional (N, L) bool/int
    returns: (output (N, d_v), attn (N, L))
    """
    n, dk = q.shape
    nk, l, dk2 = k.shape
    nv, lv, dv = v.shape
    assert (nk, dk2) == (n, dk), "k must be (N, L, d_k)"
    assert (nv, lv) == (n, l), "v must be (N, L, d_v)"

    tb = _pick_block_b(n, l, dk, dv,
                       jnp.dtype(k.dtype).itemsize, jnp.dtype(v.dtype).itemsize)
    grid = (pl.cdiv(n, tb),)                      # padded last block if tb ∤ n

    # Runtime scalar in SMEM (no recompile when temperature changes).
    inv_t = (1.0 / jnp.asarray(temperature, dtype=jnp.float32)).reshape((1,))
    smem_spec = pl.BlockSpec(memory_space=pltpu.MemorySpace.SMEM)

    q_spec = pl.BlockSpec((tb, dk), lambda i: (i, 0))
    k_spec = pl.BlockSpec((tb, l, dk), lambda i: (i, 0, 0))
    v_spec = pl.BlockSpec((tb, l, dv), lambda i: (i, 0, 0))
    out_specs = (
        pl.BlockSpec((tb, dv), lambda i: (i, 0)),   # output
        pl.BlockSpec((tb, l), lambda i: (i, 0)),    # attn weights
    )
    out_shape = (
        jax.ShapeDtypeStruct((n, dv), v.dtype),
        jax.ShapeDtypeStruct((n, l), q.dtype),
    )

    bytes_accessed = (
        n * dk * jnp.dtype(q.dtype).itemsize
        + n * l * dk * jnp.dtype(k.dtype).itemsize
        + n * l * dv * jnp.dtype(v.dtype).itemsize
        + n * dv * jnp.dtype(v.dtype).itemsize
        + n * l * jnp.dtype(q.dtype).itemsize
    )
    if mask is not None:
        bytes_accessed += n * l * 4
    cost = pl.CostEstimate(
        flops=2 * n * l * (dk + dv) + 6 * n * l,
        transcendentals=n * l,
        bytes_accessed=int(bytes_accessed),
    )
    cparams = pltpu.CompilerParams(
        dimension_semantics=("parallel",),
        vmem_limit_bytes=32 * 1024 * 1024,
    )

    if mask is None:
        return pl.pallas_call(
            _mvsdpa_kernel,
            out_shape=out_shape,
            grid=grid,
            in_specs=[smem_spec, q_spec, k_spec, v_spec],
            out_specs=out_specs,
            compiler_params=cparams,
            cost_estimate=cost,
        )(inv_t, q, k, v)
    else:
        # Additive float bias, exact masked_fill(-inf) semantics.
        bias = jnp.where(mask.astype(bool), jnp.float32(NEG_INF), jnp.float32(0.0))
        b_spec = pl.BlockSpec((tb, l), lambda i: (i, 0))
        return pl.pallas_call(
            _mvsdpa_mask_kernel,
            out_shape=out_shape,
            grid=grid,
            in_specs=[smem_spec, b_spec, q_spec, k_spec, v_spec],
            out_specs=out_specs,
            compiler_params=cparams,
            cost_estimate=cost,
        )(inv_t, bias, q, k, v)


def _ref_attention(q, k, v, temperature, mask=None):
    """Pure-JAX reference matching the PyTorch module (eval mode)."""
    attn = jnp.sum(q[:, None, :] * k, axis=2) / temperature
    if mask is not None:
        attn = jnp.where(mask.astype(bool), NEG_INF, attn)
    attn = jax.nn.softmax(attn, axis=1)
    out = jnp.sum(attn[:, :, None] * v, axis=1)
    return out, attn


if __name__ == "__main__":
    key = jax.random.PRNGKey(0)
    kq, kk, kv, km = jax.random.split(key, 4)

    # N = n*b batch rows; L and d_v multiples of 128 for lane-dense stores.
    N, L, DK, DV = 16, 128, 64, 128
    temperature = float(DK) ** 0.5

    q = jax.random.normal(kq, (N, DK), dtype=jnp.float32)
    k = jax.random.normal(kk, (N, L, DK), dtype=jnp.float32)
    v = jax.random.normal(kv, (N, L, DV), dtype=jnp.float32)

    # Tolerances slightly loosened for pl.reciprocal(approx=True) in the softmax denom.
    ATOL = RTOL = 5e-3

    # Case 1: no mask
    out, attn = mv_scaled_dot_product_attention(q, k, v, temperature)
    jax.block_until_ready((out, attn))
    ref_out, ref_attn = _ref_attention(q, k, v, temperature)
    assert out.shape == (N, DV) and attn.shape == (N, L)
    assert jnp.allclose(attn, ref_attn, atol=ATOL, rtol=RTOL), "attn (no mask) mismatch"
    assert jnp.allclose(out, ref_out, atol=ATOL, rtol=RTOL), "output (no mask) mismatch"

    # Case 2: boolean mask (True = masked out); keep >=1 valid position per row
    mask = jax.random.bernoulli(km, p=0.3, shape=(N, L))
    mask = mask.at[:, 0].set(False)
    out_m, attn_m = mv_scaled_dot_product_attention(q, k, v, temperature, mask=mask)
    jax.block_until_ready((out_m, attn_m))
    ref_out_m, ref_attn_m = _ref_attention(q, k, v, temperature, mask=mask)
    assert jnp.allclose(attn_m, ref_attn_m, atol=ATOL, rtol=RTOL), "attn (mask) mismatch"
    assert jnp.allclose(out_m, ref_out_m, atol=ATOL, rtol=RTOL), "output (mask) mismatch"

    print("KERNEL_OK")
</pallas_src>

<mosaic_0001>
module attributes {stable_mosaic.version = 11 : i64} {
  func.func @_mvsdpa_kernel(%arg0: i32, %arg1: memref<1xf32, #tpu.memory_space<smem>>, %arg2: memref<8x64xf32, #tpu.memory_space<vmem>>, %arg3: memref<8x128x64xf32, #tpu.memory_space<vmem>>, %arg4: memref<8x128x128xf32, #tpu.memory_space<vmem>>, %arg5: memref<8x128xf32, #tpu.memory_space<vmem>>, %arg6: memref<8x128xf32, #tpu.memory_space<vmem>>) attributes {dimension_semantics = [#tpu.dimension_semantics<parallel>], iteration_bounds = array<i64: 2>, scalar_prefetch = 0 : i64, scratch_operands = 0 : i64, tpu.core_type = #tpu.core_type<tc>, window_params = [{transform_indices = @transform_0, window_bounds = array<i64: 1>}, {transform_indices = @transform_1, window_bounds = array<i64: 8, 64>}, {transform_indices = @transform_2, window_bounds = array<i64: 8, 128, 64>}, {transform_indices = @transform_3, window_bounds = array<i64: 8, 128, 128>}, {transform_indices = @transform_4, window_bounds = array<i64: 8, 128>}, {transform_indices = @transform_5, window_bounds = array<i64: 8, 128>}]} {
    %c0 = arith.constant 0 : index
    %0 = memref.load %arg1[%c0] : memref<1xf32, #tpu.memory_space<smem>>
    %c0_0 = arith.constant 0 : index
    %c0_1 = arith.constant 0 : index
    %1 = vector.load %arg2[%c0_0, %c0_1] : memref<8x64xf32, #tpu.memory_space<vmem>>, vector<8x64xf32>
    %2 = vector.shape_cast %1 : vector<8x64xf32> to vector<8x1x64xf32>
    %c0_2 = arith.constant 0 : index
    %c0_3 = arith.constant 0 : index
    %c0_4 = arith.constant 0 : index
    %3 = vector.load %arg3[%c0_2, %c0_3, %c0_4] : memref<8x128x64xf32, #tpu.memory_space<vmem>>, vector<8x128x64xf32>
    %c0_5 = arith.constant 0 : index
    %c0_6 = arith.constant 0 : index
    %c0_7 = arith.constant 0 : index
    %4 = vector.load %arg4[%c0_5, %c0_6, %c0_7] : memref<8x128x128xf32, #tpu.memory_space<vmem>>, vector<8x128x128xf32>
    "tpu.trace_start"() <{level = 10 : i32, message = "bqd,bkd->bqk"}> : () -> ()
    %cst = arith.constant dense<0.000000e+00> : vector<8x1x128xf32>
    %5 = tpu.matmul %2, %3, %cst {dimension_numbers = #tpu.dot_dimension_numbers<[2], [2], [1], [1], [0, 0, 0, 1, 1, 1], [0], [0]>} : vector<8x1x64xf32>, vector<8x128x64xf32>, vector<8x1x128xf32> -> vector<8x1x128xf32>
    "tpu.trace_stop"() : () -> ()
    %6 = vector.broadcast %0 : f32 to vector<8x1x128xf32>
    %7 = arith.mulf %5, %6 : vector<8x1x128xf32>
    %cst_8 = arith.constant dense<0xFF800000> : vector<8x1xf32>
    %8 = vector.multi_reduction <maximumf>, %7, %cst_8 [2] : vector<8x1x128xf32> to vector<8x1xf32>
    %9 = vector.shape_cast %8 : vector<8x1xf32> to vector<8x1x1xf32>
    %10 = vector.broadcast %9 : vector<8x1x1xf32> to vector<8x1x128xf32>
    %11 = arith.subf %7, %10 : vector<8x1x128xf32>
    %12 = math.exp %11 : vector<8x1x128xf32>
    %cst_9 = arith.constant dense<0.000000e+00> : vector<8x1xf32>
    %13 = vector.multi_reduction <add>, %12, %cst_9 [2] : vector<8x1x128xf32> to vector<8x1xf32>
    %14 = vector.shape_cast %13 : vector<8x1xf32> to vector<8x1x1xf32>
    %15 = tpu.reciprocal %14 {approx = true} : vector<8x1x1xf32> -> vector<8x1x1xf32>
    %16 = vector.broadcast %15 : vector<8x1x1xf32> to vector<8x1x128xf32>
    %17 = arith.mulf %12, %16 : vector<8x1x128xf32>
    "tpu.trace_start"() <{level = 10 : i32, message = "bqk,bkd->bqd"}> : () -> ()
    %cst_10 = arith.constant dense<0.000000e+00> : vector<8x1x128xf32>
    %18 = tpu.matmul %17, %4, %cst_10 {dimension_numbers = #tpu.dot_dimension_numbers<[2], [1], [1], [2], [0, 0, 0, 1, 1, 2], [0], [0]>} : vector<8x1x128xf32>, vector<8x128x128xf32>, vector<8x1x128xf32> -> vector<8x1x128xf32>
    "tpu.trace_stop"() : () -> ()
    %19 = vector.shape_cast %18 : vector<8x1x128xf32> to vector<8x128xf32>
    %c0_11 = arith.constant 0 : index
    %c0_12 = arith.constant 0 : index
    %20 = vector.load %arg5[%c0_11, %c0_12] : memref<8x128xf32, #tpu.memory_space<vmem>>, vector<8x128xf32>
    tpu.vector_store %arg5[%c0_11, %c0_12], %19 {strides = array<i32>} : memref<8x128xf32, #tpu.memory_space<vmem>>, vector<8x128xf32>,
    %21 = vector.shape_cast %17 : vector<8x1x128xf32> to vector<8x128xf32>
    %c0_13 = arith.constant 0 : index
    %c0_14 = arith.constant 0 : index
    %22 = vector.load %arg6[%c0_13, %c0_14] : memref<8x128xf32, #tpu.memory_space<vmem>>, vector<8x128xf32>
    tpu.vector_store %arg6[%c0_13, %c0_14], %21 {strides = array<i32>} : memref<8x128xf32, #tpu.memory_space<vmem>>, vector<8x128xf32>,
    return
  }
  func.func @transform_0(%arg0: i32) -> i32 {
    %c0_i32 = arith.constant 0 : i32
    %c0_i32_0 = arith.constant 0 : i32
    return %c0_i32 : i32
  }
  func.func @transform_1(%arg0: i32) -> (i32, i32) {
    %c0_i32 = arith.constant 0 : i32
    %c0_i32_0 = arith.constant 0 : i32
    return %arg0, %c0_i32 : i32, i32
  }
  func.func @transform_2(%arg0: i32) -> (i32, i32, i32) {
    %c0_i32 = arith.constant 0 : i32
    %c0_i32_0 = arith.constant 0 : i32
    %c0_i32_1 = arith.constant 0 : i32
    return %arg0, %c0_i32, %c0_i32_0 : i32, i32, i32
  }
  func.func @transform_3(%arg0: i32) -> (i32, i32, i32) {
    %c0_i32 = arith.constant 0 : i32
    %c0_i32_0 = arith.constant 0 : i32
    %c0_i32_1 = arith.constant 0 : i32
    return %arg0, %c0_i32, %c0_i32_0 : i32, i32, i32
  }
  func.func @transform_4(%arg0: i32) -> (i32, i32) {
    %c0_i32 = arith.constant 0 : i32
    %c0_i32_0 = arith.constant 0 : i32
    return %arg0, %c0_i32 : i32, i32
  }
  func.func @transform_5(%arg0: i32) -> (i32, i32) {
    %c0_i32 = arith.constant 0 : i32
    %c0_i32_0 = arith.constant 0 : i32
    return %arg0, %c0_i32 : i32, i32
  }
}

</mosaic_0001>

<bundles_post_ra>
// kernel: tpu_custom_call.1
= control target key start
LH: loop header
LB: loop body
LE: loop exit
PB: predicated region body
PF: predicated region fallthrough
CT: control target
= control target key end

     0   :  { %s2552_s0 = inlined_call_operand.<no memory space> [shape: f32[1], index: 0, kind: input, shape index: {}]   ;;  %s2553_s1 = inlined_call_operand.vmem [shape: f32[16,64], index: 1, kind: input, shape index: {}]   ;;  %s2554_s2 = inlined_call_operand.vmem [shape: f32[16,128,64], index: 2, kind: input, shape index: {}]   ;;  %s2555_s3 = inlined_call_operand.vmem [shape: f32[16,128,128], index: 3, kind: input, shape index: {}]   ;;  %s2556_s4 = inlined_call_operand.hbm [shape: f32[16,128], index: 4, kind: output, shape index: {0}]   ;;  %s2557_s5 = inlined_call_operand.hbm [shape: f32[16,128], index: 5, kind: output, shape index: {1}]  }
   0x1   :  { %11 = sst [smem:[#allocation2]] %s2552_s0 }
   0x2   :  { %12 = vsyncpa [#allocation4], 0 }
   0x3   :  { %14 = vsyncpa [#allocation4 + $0x1], 0 }
   0x4   :  { %15 = vsyncpa [#allocation6], 0 }
   0x5   :  { %17 = vsyncpa [#allocation6 + $0x1], 0  ;;  %s1935_s20 = smov 0   ;;  %s1937_s21 = smov 0  }
   0x6   :  { %s1939_s22 = smov 0   ;;  %s1941_s23 = smov 0  }
   0x7 LB: > { %s1956_s0 = sadd.s32 4294967295, %s1900_s23   ;;  %s1573_s24 = sadd.s32 4294967294, %s1900_s23   ;;  %s1900_s23 = sphi %s1941_s23, %s2563_s23   ;;  %s1896_s22 = sphi %s1939_s22, %s2562_s22   ;;  %s1892_s21 = sphi %s1937_s21, %s2561_s21   ;;  %s1888_s20 = sphi %s1935_s20, %s2560_s20  }
   0x8   : > { %s1960_s25 = sadd.s32 1, %s1900_s23   ;;  %s129_s26 = sadd.s32 1, %s1896_s22 }
   0x9   : > { %s126_s27 = ssub.s32 %s1900_s23, %s1960_s25  ;;  %p139_p0 = scmp.ne.s32.totalorder %s1896_s22, %s1892_s21 }
   0xa   : > { %p127_p1 = scmp.eq.s32.totalorder %s126_s27, 0  ;;  %p140_p2 = scmp.eq.s32.totalorder %s1956_s0, 1 }
   0xb   : > { %p145_p3 = scmp.ne.s32.totalorder %s1892_s21, %s1888_s20  ;;  %p146_p4 = scmp.eq.s32.totalorder %s1573_s24, 1 }
   0xc   : > { %s1971_s28 = scalar_select %p127_p1, %s1896_s22, %s129_s26  }
   0xd   : > { %p1973_p5 = por %p140_p2, %p139_p0  ;;  %p1977_p6 = por %p146_p4, %p145_p3 }
   0xe   : > { %p1576_p7 = scmp.ge.s32.totalorder %s1900_s23, 1  ;;  %p220_p8 = scmp.lt.s32.totalorder %s1900_s23, 3 }
  0x10   : > { %p221_p9 = pnand %p1576_p7, %p220_p8 }
  0x11   : > { %s1984_s6 = sshll.u32 (!%p221_p9), %s1956_s0, 3  ;;  %p264_p11 = scmp.lt.s32.totalorder (!%p221_p9), %s1956_s0, 1 }
  0x12   : > { %224 = sbr.rel (%p221_p9) target bundleno = 692 (0x2b4), region = 36  ;;  %p269_p10 = scmp.lt.s32.totalorder (!%p221_p9), %s1984_s6, 15 }
  0x13   : > { %s282_s16 = sld [smem:[#allocation2]] (!%p221_p9) }
  0x17   : > { %s1988_s7 = scalar_select %p269_p10, %s1984_s6, 15  ;;  %vm548_vm0 = vcmask 523264   ;;  %vm1118_vm1 = vcmask 1040384   ;;  %vm1376_vm2 = vcmask 1041409   ;;  %vm1379_vm3 = vcmask 1042434  }
  0x18   : > { %s2565_s0 = smov (!%p264_p11, %s1956_s0), 1  ;;  %vm1382_vm4 = vcmask 1043459   ;;  %vm1385_vm5 = vcmask 1044484   ;;  %vm1388_vm6 = vcmask 1045509   ;;  %vm1391_vm7 = vcmask 1046534  }
  0x19   : > { %s1728_s8 = sshll.u32 %s1988_s7, 7  ;;  %s1579_s12 = sshll.u32 %s2565_s0, 3  ;;  %vm1394_vm8 = vcmask 1047559  }
  0x1a   : > { %s1996_s11 = scalar_lea.vmem %s2554_s2, %s1728_s8  ;;  %s267_s15 = scalar_lea.vmem %s2553_s1, %s1579_s12 }
  0x1b   : > { %v307_v0 = vld [vmem:[%s1996_s11 + $0x78] sm:$0xff]  ;;  %v306_v3 = vld [vmem:[%s1996_s11 + $0x70] sm:$0xff]  ;;  %v305_v8 = vld [vmem:[%s1996_s11 + $0x68] sm:$0xff]  ;;  %s2318_s19 = scalar_lea.vmem %s2555_s3, %s1728_s8  ;;  %s2482_s0 = sand.u32 1, %s1892_s21  }
  0x1c   : > { %v323_v1 = vld [vmem:[%s1996_s11 + $0xf8] sm:$0xff]  ;;  %1586 = vmatpush.xpose.msk.msra.mxu0 %vm548_vm0, %v307_v0  ;;  %v322_v4 = vld [vmem:[%s1996_s11 + $0xf0] sm:$0xff]  ;;  %v321_v9 = vld [vmem:[%s1996_s11 + $0xe8] sm:$0xff]  ;;  %s1577_s24 = sshll.u32 %s2482_s0, 3  ;;  %s1452_s8 = scalar_lea.hbm %s2557_s5, %s1984_s6 }
  0x1d   : > { %v339_v2 = vld [vmem:[%s1996_s11 + $0x178] sm:$0xff]  ;;  %1603 = vmatpush.xpose.msk.msra.mxu1 %vm548_vm0, %v323_v1  ;;  %v338_v5 = vld [vmem:[%s1996_s11 + $0x170] sm:$0xff]  ;;  %v337_v10 = vld [vmem:[%s1996_s11 + $0x168] sm:$0xff]  ;;  %s263_s26 = scalar_lea.vmem [#allocation5], %s1577_s24  ;;  %s1456_s10 = sshll.u32 %s1452_s8, 4  ;;  %s1457_s10 = int_to_ptr.hbm [resolvable:$true] %s1456_s10 }
  0x1e   : > { %1620 = vmatpush.xpose.msk.msra.mxu2 %vm548_vm0, %v339_v2  ;;  %v355_v6 = vld [vmem:[%s1996_s11 + $0x1f8] sm:$0xff]  ;;  %v354_v7 = vld [vmem:[%s1996_s11 + $0x1f0] sm:$0xff]  ;;  %v353_v11 = vld [vmem:[%s1996_s11 + $0x1e8] sm:$0xff]  ;;  %s1454_s9 = sshll.u32 %s263_s26, 4  ;;  %s1820_s12 = sshra.s32 %s1457_s10, 4  ;;  %s1455_s9 = int_to_ptr.vmem [resolvable:$true] %s1454_s9  ;;  %s1821_s12 = int_to_ptr.hbm [resolvable:$true] %s1820_s12 }
  0x1f   : > { %1637 = vmatpush.xpose.msk.msra.mxu3 %vm548_vm0, %v355_v6  ;;  %v304_v12 = vld [vmem:[%s1996_s11 + $0x60] sm:$0xff]  ;;  %v303_v16 = vld [vmem:[%s1996_s11 + $0x58] sm:$0xff]  ;;  %v302_v20 = vld [vmem:[%s1996_s11 + $0x50] sm:$0xff]  ;;  %s1822_s13 = scalar_lea.hbm %s1821_s12, 8  ;;  %p1827_p1 = scmp.lt.s32.totalorder %s1821_s12, %s2557_s5 }
  0x20   : > { %1587 = vmatpush.xpose.msk.msra.mxu0 %vm548_vm0, %v306_v3  ;;  %v320_v13 = vld [vmem:[%s1996_s11 + $0xe0] sm:$0xff]  ;;  %v319_v17 = vld [vmem:[%s1996_s11 + $0xd8] sm:$0xff]  ;;  %v318_v21 = vld [vmem:[%s1996_s11 + $0xd0] sm:$0xff]  ;;  %p1823_p12 = scmp.ne.s32.totalorder %s1821_s12, %s1822_s13 }
  0x21   : > { %1604 = vmatpush.xpose.msk.msra.mxu1 %vm548_vm0, %v322_v4  ;;  %v336_v14 = vld [vmem:[%s1996_s11 + $0x160] sm:$0xff]  ;;  %v335_v18 = vld [vmem:[%s1996_s11 + $0x158] sm:$0xff]  ;;  %v334_v22 = vld [vmem:[%s1996_s11 + $0x150] sm:$0xff] }
  0x22   : > { %1621 = vmatpush.xpose.msk.msra.mxu2 %vm548_vm0, %v338_v5  ;;  %v352_v15 = vld [vmem:[%s1996_s11 + $0x1e0] sm:$0xff]  ;;  %v351_v19 = vld [vmem:[%s1996_s11 + $0x1d8] sm:$0xff]  ;;  %v350_v23 = vld [vmem:[%s1996_s11 + $0x1d0] sm:$0xff]  ;;  %p1824_p13 = pnand %p1823_p12, %p1973_p5 }
  0x23   : > { %1638 = vmatpush.xpose.msk.msra.mxu3 %vm548_vm0, %v354_v7  ;;  %v301_v24 = vld [vmem:[%s1996_s11 + $0x48] sm:$0xff]  ;;  %v300_v28 = vld [vmem:[%s1996_s11 + $0x40] sm:$0xff]  ;;  %v299_v32 = vld [vmem:[%s1996_s11 + $0x38] sm:$0xff] }
  0x24   : > { %1588 = vmatpush.xpose.msk.msra.mxu0 %vm548_vm0, %v305_v8  ;;  %v317_v25 = vld [vmem:[%s1996_s11 + $0xc8] sm:$0xff]  ;;  %v316_v29 = vld [vmem:[%s1996_s11 + $0xc0] sm:$0xff]  ;;  %v315_v33 = vld [vmem:[%s1996_s11 + $0xb8] sm:$0xff]  ;;  %p1825_p0 = pneg %p1824_p13 }
  0x25   : > { %1605 = vmatpush.xpose.msk.msra.mxu1 %vm548_vm0, %v321_v9  ;;  %v333_v26 = vld [vmem:[%s1996_s11 + $0x148] sm:$0xff]  ;;  %v332_v30 = vld [vmem:[%s1996_s11 + $0x140] sm:$0xff]  ;;  %v331_v34 = vld [vmem:[%s1996_s11 + $0x138] sm:$0xff] }
  0x26   : > { %1622 = vmatpush.xpose.msk.msra.mxu2 %vm548_vm0, %v337_v10  ;;  %v349_v27 = vld [vmem:[%s1996_s11 + $0x1c8] sm:$0xff]  ;;  %v348_v31 = vld [vmem:[%s1996_s11 + $0x1c0] sm:$0xff]  ;;  %v347_v35 = vld [vmem:[%s1996_s11 + $0x1b8] sm:$0xff] }
  0x27   : > { %1639 = vmatpush.xpose.msk.msra.mxu3 %vm548_vm0, %v353_v11  ;;  %v298_v36 = vld [vmem:[%s1996_s11 + $0x30] sm:$0xff]  ;;  %v297_v40 = vld [vmem:[%s1996_s11 + $0x28] sm:$0xff]  ;;  %v296_v44 = vld [vmem:[%s1996_s11 + $0x20] sm:$0xff] }
  0x28   : > { %1589 = vmatpush.xpose.msk.msra.mxu0 %vm548_vm0, %v304_v12  ;;  %v314_v37 = vld [vmem:[%s1996_s11 + $0xb0] sm:$0xff]  ;;  %v313_v41 = vld [vmem:[%s1996_s11 + $0xa8] sm:$0xff]  ;;  %v312_v45 = vld [vmem:[%s1996_s11 + $0xa0] sm:$0xff] }
  0x29   : > { %1606 = vmatpush.xpose.msk.msra.mxu1 %vm548_vm0, %v320_v13  ;;  %v330_v38 = vld [vmem:[%s1996_s11 + $0x130] sm:$0xff]  ;;  %v329_v42 = vld [vmem:[%s1996_s11 + $0x128] sm:$0xff]  ;;  %v328_v46 = vld [vmem:[%s1996_s11 + $0x120] sm:$0xff] }
  0x2a   : > { %1623 = vmatpush.xpose.msk.msra.mxu2 %vm548_vm0, %v336_v14  ;;  %v346_v39 = vld [vmem:[%s1996_s11 + $0x1b0] sm:$0xff]  ;;  %v345_v43 = vld [vmem:[%s1996_s11 + $0x1a8] sm:$0xff]  ;;  %v344_v47 = vld [vmem:[%s1996_s11 + $0x1a0] sm:$0xff] }
  0x2b   : > { %1640 = vmatpush.xpose.msk.msra.mxu3 %vm548_vm0, %v352_v15  ;;  %v295_v48 = vld [vmem:[%s1996_s11 + $0x18] sm:$0xff]  ;;  %v294_v52 = vld [vmem:[%s1996_s11 + $0x10] sm:$0xff]  ;;  %v293_v56 = vld [vmem:[%s1996_s11 + $0x8] sm:$0xff] }
  0x2c   : > { %1590 = vmatpush.xpose.msk.msra.mxu0 %vm548_vm0, %v303_v16  ;;  %v311_v49 = vld [vmem:[%s1996_s11 + $0x98] sm:$0xff]  ;;  %v310_v53 = vld [vmem:[%s1996_s11 + $0x90] sm:$0xff]  ;;  %v309_v57 = vld [vmem:[%s1996_s11 + $0x88] sm:$0xff] }
  0x2d   : > { %1607 = vmatpush.xpose.msk.msra.mxu1 %vm548_vm0, %v319_v17  ;;  %v327_v50 = vld [vmem:[%s1996_s11 + $0x118] sm:$0xff]  ;;  %v326_v54 = vld [vmem:[%s1996_s11 + $0x110] sm:$0xff]  ;;  %v325_v58 = vld [vmem:[%s1996_s11 + $0x108] sm:$0xff] }
  0x2e   : > { %1624 = vmatpush.xpose.msk.msra.mxu2 %vm548_vm0, %v335_v18  ;;  %v343_v51 = vld [vmem:[%s1996_s11 + $0x198] sm:$0xff]  ;;  %v342_v55 = vld [vmem:[%s1996_s11 + $0x190] sm:$0xff]  ;;  %v341_v59 = vld [vmem:[%s1996_s11 + $0x188] sm:$0xff] }
  0x2f   : > { %1641 = vmatpush.xpose.msk.msra.mxu3 %vm548_vm0, %v351_v19  ;;  %v292_v60 = vld [vmem:[%s1996_s11] sm:$0xff]  ;;  %v371_v0 = vld [vmem:[%s1996_s11 + $0x278] sm:$0xff]  ;;  %v370_v7 = vld [vmem:[%s1996_s11 + $0x270] sm:$0xff] }
  0x30   : > { %1591 = vmatpush.xpose.msk.msra.mxu0 %vm548_vm0, %v302_v20  ;;  %v308_v61 = vld [vmem:[%s1996_s11 + $0x80] sm:$0xff]  ;;  %v387_v1 = vld [vmem:[%s1996_s11 + $0x2f8] sm:$0xff]  ;;  %v386_v8 = vld [vmem:[%s1996_s11 + $0x2f0] sm:$0xff] }
  0x31   : > { %1608 = vmatpush.xpose.msk.msra.mxu1 %vm548_vm0, %v318_v21  ;;  %v2124_v62 = vld [vmem:[%s267_s15] sm:$0xff]  ;;  %v403_v2 = vld [vmem:[%s1996_s11 + $0x378] sm:$0xff]  ;;  %v402_v9 = vld [vmem:[%s1996_s11 + $0x370] sm:$0xff] }
  0x32   : > { %1625 = vmatpush.xpose.msk.msra.mxu2 %vm548_vm0, %v334_v22  ;;  %v324_v63 = vld [vmem:[%s1996_s11 + $0x100] sm:$0xff]  ;;  %v286_v3 = vrot.slane %v2124_v62, 2  ;;  %v419_v5 = vld [vmem:[%s1996_s11 + $0x3f8] sm:$0xff]  ;;  %v285_v6 = vrot.slane %v2124_v62, 1  ;;  %v287_v10 = vrot.slane %v2124_v62, 3  ;;  %v418_v11 = vld [vmem:[%s1996_s11 + $0x3f0] sm:$0xff] }
  0x33   : > { %1642 = vmatpush.xpose.msk.msra.mxu3 %vm548_vm0, %v350_v23  ;;  %v340_v4 = vld [vmem:[%s1996_s11 + $0x180] sm:$0xff]  ;;  %v369_v12 = vld [vmem:[%s1996_s11 + $0x268] sm:$0xff]  ;;  %v367_v20 = vld [vmem:[%s1996_s11 + $0x258] sm:$0xff] }
  0x34   : > { %1592 = vmatpush.xpose.msk.msra.mxu0 %vm548_vm0, %v301_v24  ;;  %v385_v13 = vld [vmem:[%s1996_s11 + $0x2e8] sm:$0xff]  ;;  %v368_v16 = vld [vmem:[%s1996_s11 + $0x260] sm:$0xff]  ;;  %v383_v21 = vld [vmem:[%s1996_s11 + $0x2d8] sm:$0xff] }
  0x35   : > { %1609 = vmatpush.xpose.msk.msra.mxu1 %vm548_vm0, %v317_v25  ;;  %v401_v14 = vld [vmem:[%s1996_s11 + $0x368] sm:$0xff]  ;;  %v384_v17 = vld [vmem:[%s1996_s11 + $0x2e0] sm:$0xff]  ;;  %v399_v22 = vld [vmem:[%s1996_s11 + $0x358] sm:$0xff] }
  0x36   : > { %1626 = vmatpush.xpose.msk.msra.mxu2 %vm548_vm0, %v333_v26  ;;  %v417_v15 = vld [vmem:[%s1996_s11 + $0x3e8] sm:$0xff]  ;;  %v400_v18 = vld [vmem:[%s1996_s11 + $0x360] sm:$0xff]  ;;  %v415_v23 = vld [vmem:[%s1996_s11 + $0x3d8] sm:$0xff] }
  0x37   : > { %1643 = vmatpush.xpose.msk.msra.mxu3 %vm548_vm0, %v349_v27  ;;  %v416_v19 = vld [vmem:[%s1996_s11 + $0x3e0] sm:$0xff]  ;;  %v366_v24 = vld [vmem:[%s1996_s11 + $0x250] sm:$0xff] }
  0x38   : > { %1593 = vmatpush.xpose.msk.msra.mxu0 %vm548_vm0, %v300_v28  ;;  %v382_v25 = vld [vmem:[%s1996_s11 + $0x2d0] sm:$0xff]  ;;  %v365_v28 = vld [vmem:[%s1996_s11 + $0x248] sm:$0xff] }
  0x39   : > { %1610 = vmatpush.xpose.msk.msra.mxu1 %vm548_vm0, %v316_v29  ;;  %v398_v26 = vld [vmem:[%s1996_s11 + $0x350] sm:$0xff]  ;;  %v381_v29 = vld [vmem:[%s1996_s11 + $0x2c8] sm:$0xff] }
  0x3a   : > { %1627 = vmatpush.xpose.msk.msra.mxu2 %vm548_vm0, %v332_v30  ;;  %v414_v27 = vld [vmem:[%s1996_s11 + $0x3d0] sm:$0xff]  ;;  %v397_v30 = vld [vmem:[%s1996_s11 + $0x348] sm:$0xff] }
  0x3b   : > { %1644 = vmatpush.xpose.msk.msra.mxu3 %vm548_vm0, %v348_v31  ;;  %v413_v31 = vld [vmem:[%s1996_s11 + $0x3c8] sm:$0xff] }
  0x3c   : > { %1594 = vmatpush.xpose.msk.msra.mxu0 %vm548_vm0, %v299_v32  ;;  %v364_v32 = vld [vmem:[%s1996_s11 + $0x240] sm:$0xff] }
  0x3d   : > { %1611 = vmatpush.xpose.msk.msra.mxu1 %vm548_vm0, %v315_v33  ;;  %v380_v33 = vld [vmem:[%s1996_s11 + $0x2c0] sm:$0xff] }
  0x3e   : > { %1628 = vmatpush.xpose.msk.msra.mxu2 %vm548_vm0, %v331_v34  ;;  %v396_v34 = vld [vmem:[%s1996_s11 + $0x340] sm:$0xff] }
  0x3f   : > { %1645 = vmatpush.xpose.msk.msra.mxu3 %vm548_vm0, %v347_v35  ;;  %v412_v35 = vld [vmem:[%s1996_s11 + $0x3c0] sm:$0xff] }
  0x40   : > { %1595 = vmatpush.xpose.msk.msra.mxu0 %vm548_vm0, %v298_v36  ;;  %v363_v36 = vld [vmem:[%s1996_s11 + $0x238] sm:$0xff] }
  0x41   : > { %1612 = vmatpush.xpose.msk.msra.mxu1 %vm548_vm0, %v314_v37  ;;  %v379_v37 = vld [vmem:[%s1996_s11 + $0x2b8] sm:$0xff] }
  0x42   : > { %1629 = vmatpush.xpose.msk.msra.mxu2 %vm548_vm0, %v330_v38  ;;  %v395_v38 = vld [vmem:[%s1996_s11 + $0x338] sm:$0xff] }
  0x43   : > { %1646 = vmatpush.xpose.msk.msra.mxu3 %vm548_vm0, %v346_v39  ;;  %v411_v39 = vld [vmem:[%s1996_s11 + $0x3b8] sm:$0xff] }
  0x44   : > { %1596 = vmatpush.xpose.msk.msra.mxu0 %vm548_vm0, %v297_v40  ;;  %v362_v40 = vld [vmem:[%s1996_s11 + $0x230] sm:$0xff] }
  0x45   : > { %1613 = vmatpush.xpose.msk.msra.mxu1 %vm548_vm0, %v313_v41  ;;  %v378_v41 = vld [vmem:[%s1996_s11 + $0x2b0] sm:$0xff] }
  0x46   : > { %1630 = vmatpush.xpose.msk.msra.mxu2 %vm548_vm0, %v329_v42  ;;  %v394_v42 = vld [vmem:[%s1996_s11 + $0x330] sm:$0xff] }
  0x47   : > { %1647 = vmatpush.xpose.msk.msra.mxu3 %vm548_vm0, %v345_v43  ;;  %v410_v43 = vld [vmem:[%s1996_s11 + $0x3b0] sm:$0xff] }
  0x48   : > { %1597 = vmatpush.xpose.msk.msra.mxu0 %vm548_vm0, %v296_v44  ;;  %v361_v44 = vld [vmem:[%s1996_s11 + $0x228] sm:$0xff] }
  0x49   : > { %1614 = vmatpush.xpose.msk.msra.mxu1 %vm548_vm0, %v312_v45  ;;  %v377_v45 = vld [vmem:[%s1996_s11 + $0x2a8] sm:$0xff] }
  0x4a   : > { %1631 = vmatpush.xpose.msk.msra.mxu2 %vm548_vm0, %v328_v46  ;;  %v393_v46 = vld [vmem:[%s1996_s11 + $0x328] sm:$0xff] }
  0x4b   : > { %1648 = vmatpush.xpose.msk.msra.mxu3 %vm548_vm0, %v344_v47  ;;  %v409_v47 = vld [vmem:[%s1996_s11 + $0x3a8] sm:$0xff] }
  0x4c   : > { %1598 = vmatpush.xpose.msk.msra.mxu0 %vm548_vm0, %v295_v48  ;;  %v360_v48 = vld [vmem:[%s1996_s11 + $0x220] sm:$0xff] }
  0x4d   : > { %1615 = vmatpush.xpose.msk.msra.mxu1 %vm548_vm0, %v311_v49  ;;  %v376_v49 = vld [vmem:[%s1996_s11 + $0x2a0] sm:$0xff] }
  0x4e   : > { %1632 = vmatpush.xpose.msk.msra.mxu2 %vm548_vm0, %v327_v50  ;;  %v392_v50 = vld [vmem:[%s1996_s11 + $0x320] sm:$0xff] }
  0x4f   : > { %1649 = vmatpush.xpose.msk.msra.mxu3 %vm548_vm0, %v343_v51  ;;  %v408_v51 = vld [vmem:[%s1996_s11 + $0x3a0] sm:$0xff] }
  0x50   : > { %1599 = vmatpush.xpose.msk.msra.mxu0 %vm548_vm0, %v294_v52  ;;  %v359_v52 = vld [vmem:[%s1996_s11 + $0x218] sm:$0xff] }
  0x51   : > { %1616 = vmatpush.xpose.msk.msra.mxu1 %vm548_vm0, %v310_v53  ;;  %v375_v53 = vld [vmem:[%s1996_s11 + $0x298] sm:$0xff] }
  0x52   : > { %1633 = vmatpush.xpose.msk.msra.mxu2 %vm548_vm0, %v326_v54  ;;  %v391_v54 = vld [vmem:[%s1996_s11 + $0x318] sm:$0xff] }
  0x53   : > { %1650 = vmatpush.xpose.msk.msra.mxu3 %vm548_vm0, %v342_v55  ;;  %v407_v55 = vld [vmem:[%s1996_s11 + $0x398] sm:$0xff] }
  0x54   : > { %1600 = vmatpush.xpose.msk.msra.mxu0 %vm548_vm0, %v293_v56  ;;  %v358_v56 = vld [vmem:[%s1996_s11 + $0x210] sm:$0xff] }
  0x55   : > { %1617 = vmatpush.xpose.msk.msra.mxu1 %vm548_vm0, %v309_v57  ;;  %v374_v57 = vld [vmem:[%s1996_s11 + $0x290] sm:$0xff] }
  0x56   : > { %1634 = vmatpush.xpose.msk.msra.mxu2 %vm548_vm0, %v325_v58  ;;  %v390_v58 = vld [vmem:[%s1996_s11 + $0x310] sm:$0xff] }
  0x57   : > { %1651 = vmatpush.xpose.msk.msra.mxu3 %vm548_vm0, %v341_v59  ;;  %v406_v59 = vld [vmem:[%s1996_s11 + $0x390] sm:$0xff] }
  0x58   : > { %1601 = vmatpush.xpose.msk.msra.mxu0 %vm548_vm0, %v292_v60  ;;  %v357_v60 = vld [vmem:[%s1996_s11 + $0x208] sm:$0xff] }
  0x59   : > { %1618 = vmatpush.xpose.msk.msra.mxu1 %vm548_vm0, %v308_v61  ;;  %v373_v61 = vld [vmem:[%s1996_s11 + $0x288] sm:$0xff] }
  0x5a   : > { %1635 = vmatpush.xpose.msk.msra.mxu2 %vm548_vm0, %v324_v63  ;;  %v389_v63 = vld [vmem:[%s1996_s11 + $0x308] sm:$0xff] }
  0x5b   : > { %1602 = vmatmul.msk.f32.vlgmr.msra.gmra.mxu0 %vm548_vm0, %v2124_v62  ;;  %1652 = vmatpush.xpose.msk.msra.mxu3 %vm548_vm0, %v340_v4  ;;  %v288_v4 = vrot.slane %v2124_v62, 4 }
  0x5c   : > { %1654 = vmatpush.xpose.msk.msrb.mxu0 %vm548_vm0, %v371_v0  ;;  %1619 = vmatmul.msk.f32.vlgmr.msra.gmra.mxu1 %vm548_vm0, %v285_v6  ;;  %v405_v0 = vld [vmem:[%s1996_s11 + $0x388] sm:$0xff]  ;;  %v290_v6 = vrot.slane %v2124_v62, 6 }
  0x5d   : > { %1671 = vmatpush.xpose.msk.msrb.mxu1 %vm548_vm0, %v387_v1  ;;  %1636 = vmatmul.msk.f32.vlgmr.msra.gmra.mxu2 %vm548_vm0, %v286_v3  ;;  %v356_v1 = vld [vmem:[%s1996_s11 + $0x200] sm:$0xff] }
  0x5e   : > { %1688 = vmatpush.xpose.msk.msrb.mxu2 %vm548_vm0, %v403_v2  ;;  %1653 = vmatmul.msk.f32.vlgmr.msra.gmra.mxu3 %vm548_vm0, %v287_v10  ;;  %v372_v2 = vld [vmem:[%s1996_s11 + $0x280] sm:$0xff] }
  0x5f   : > { %1705 = vmatpush.xpose.msk.msrb.mxu3 %vm548_vm0, %v419_v5  ;;  %v388_v3 = vld [vmem:[%s1996_s11 + $0x300] sm:$0xff]  ;;  %v289_v5 = vrot.slane %v2124_v62, 5 }
  0x60   : > { %1655 = vmatpush.xpose.msk.msrb.mxu0 %vm548_vm0, %v370_v7  ;;  %v404_v7 = vld [vmem:[%s1996_s11 + $0x380] sm:$0xff]  ;;  %s1428_s11 = scalar_lea.sflag [#allocation6], %s2482_s0 }
  0x61   : > { %1672 = vmatpush.xpose.msk.msrb.mxu1 %vm548_vm0, %v386_v8  ;;  %v291_v8 = vrot.slane %v2124_v62, 7 }
  0x62   : > { %1689 = vmatpush.xpose.msk.msrb.mxu2 %vm548_vm0, %v402_v9  ;;  %v1109_v9 = vstv %s282_s16  ;;  %s1826_s16 = scalar_lea.hbm %s2557_s5, 16 }
  0x63   : > { %1706 = vmatpush.xpose.msk.msrb.mxu3 %vm548_vm0, %v418_v11  ;;  %p1828_p2 = scmp.lt.s32.totalorder %s1826_s16, %s1822_s13 }
  0x64   : > { %1656 = vmatpush.xpose.msk.msrb.mxu0 %vm548_vm0, %v369_v12 }
  0x65   : > { %1673 = vmatpush.xpose.msk.msrb.mxu1 %vm548_vm0, %v385_v13  ;;  %p1829_p3 = por %p1828_p2, %p1827_p1 }
  0x66   : > { %1690 = vmatpush.xpose.msk.msrb.mxu2 %vm548_vm0, %v401_v14 }
  0x67   : > { %1707 = vmatpush.xpose.msk.msrb.mxu3 %vm548_vm0, %v417_v15  ;;  %p1830_p4 = pnand %p1829_p3, %p1825_p0 }
  0x68   : > { %1657 = vmatpush.xpose.msk.msrb.mxu0 %vm548_vm0, %v368_v16 }
  0x69   : > { %1674 = vmatpush.xpose.msk.msrb.mxu1 %vm548_vm0, %v384_v17 }
  0x6a   : > { %1691 = vmatpush.xpose.msk.msrb.mxu2 %vm548_vm0, %v400_v18 }
  0x6b   : > { %1708 = vmatpush.xpose.msk.msrb.mxu3 %vm548_vm0, %v416_v19 }
  0x6c   : > { %1658 = vmatpush.xpose.msk.msrb.mxu0 %vm548_vm0, %v367_v20 }
  0x6d   : > { %1675 = vmatpush.xpose.msk.msrb.mxu1 %vm548_vm0, %v383_v21 }
  0x6e   : > { %1692 = vmatpush.xpose.msk.msrb.mxu2 %vm548_vm0, %v399_v22 }
  0x6f   : > { %1709 = vmatpush.xpose.msk.msrb.mxu3 %vm548_vm0, %v415_v23 }
  0x70   : > { %1659 = vmatpush.xpose.msk.msrb.mxu0 %vm548_vm0, %v366_v24 }
  0x71   : > { %1676 = vmatpush.xpose.msk.msrb.mxu1 %vm548_vm0, %v382_v25 }
  0x72   : > { %1693 = vmatpush.xpose.msk.msrb.mxu2 %vm548_vm0, %v398_v26 }
  0x73   : > { %1710 = vmatpush.xpose.msk.msrb.mxu3 %vm548_vm0, %v414_v27 }
  0x74   : > { %1660 = vmatpush.xpose.msk.msrb.mxu0 %vm548_vm0, %v365_v28 }
  0x75   : > { %1677 = vmatpush.xpose.msk.msrb.mxu1 %vm548_vm0, %v381_v29 }
  0x76   : > { %1694 = vmatpush.xpose.msk.msrb.mxu2 %vm548_vm0, %v397_v30 }
  0x77   : > { %1711 = vmatpush.xpose.msk.msrb.mxu3 %vm548_vm0, %v413_v31 }
  0x78   : > { %1661 = vmatpush.xpose.msk.msrb.mxu0 %vm548_vm0, %v364_v32 }
  0x79   : > { %1678 = vmatpush.xpose.msk.msrb.mxu1 %vm548_vm0, %v380_v33 }
  0x7a   : > { %1695 = vmatpush.xpose.msk.msrb.mxu2 %vm548_vm0, %v396_v34 }
  0x7b   : > { %1712 = vmatpush.xpose.msk.msrb.mxu3 %vm548_vm0, %v412_v35 }
  0x7c   : > { %1662 = vmatpush.xpose.msk.msrb.mxu0 %vm548_vm0, %v363_v36 }
  0x7d   : > { %1679 = vmatpush.xpose.msk.msrb.mxu1 %vm548_vm0, %v379_v37 }
  0x7e   : > { %1696 = vmatpush.xpose.msk.msrb.mxu2 %vm548_vm0, %v395_v38 }
  0x7f   : > { %1713 = vmatpush.xpose.msk.msrb.mxu3 %vm548_vm0, %v411_v39 }
  0x80   : > { %1663 = vmatpush.xpose.msk.msrb.mxu0 %vm548_vm0, %v362_v40 }
  0x81   : > { %1680 = vmatpush.xpose.msk.msrb.mxu1 %vm548_vm0, %v378_v41 }
  0x82   : > { %1697 = vmatpush.xpose.msk.msrb.mxu2 %vm548_vm0, %v394_v42 }
  0x83   : > { %1714 = vmatpush.xpose.msk.msrb.mxu3 %vm548_vm0, %v410_v43 }
  0x84   : > { %1664 = vmatpush.xpose.msk.msrb.mxu0 %vm548_vm0, %v361_v44 }
  0x85   : > { %1681 = vmatpush.xpose.msk.msrb.mxu1 %vm548_vm0, %v377_v45 }
  0x86   : > { %1698 = vmatpush.xpose.msk.msrb.mxu2 %vm548_vm0, %v393_v46 }
  0x87   : > { %1715 = vmatpush.xpose.msk.msrb.mxu3 %vm548_vm0, %v409_v47 }
  0x88   : > { %1665 = vmatpush.xpose.msk.msrb.mxu0 %vm548_vm0, %v360_v48 }
  0x89   : > { %1682 = vmatpush.xpose.msk.msrb.mxu1 %vm548_vm0, %v376_v49 }
  0x8a   : > { %1699 = vmatpush.xpose.msk.msrb.mxu2 %vm548_vm0, %v392_v50 }
  0x8b   : > { %1716 = vmatpush.xpose.msk.msrb.mxu3 %vm548_vm0, %v408_v51 }
  0x8c   : > { %1666 = vmatpush.xpose.msk.msrb.mxu0 %vm548_vm0, %v359_v52 }
  0x8d   : > { %1683 = vmatpush.xpose.msk.msrb.mxu1 %vm548_vm0, %v375_v53  ;;  %v435_v53 = vld [vmem:[%s2318_s19 + $0x78] sm:$0xff] }
  0x8e   : > { %1700 = vmatpush.xpose.msk.msrb.mxu2 %vm548_vm0, %v391_v54  ;;  %v434_v54 = vld [vmem:[%s2318_s19 + $0x70] sm:$0xff] }
  0x8f   : > { %1717 = vmatpush.xpose.msk.msrb.mxu3 %vm548_vm0, %v407_v55  ;;  %v467_v55 = vld [vmem:[%s2318_s19 + $0x178] sm:$0xff] }
  0x90   : > { %1667 = vmatpush.xpose.msk.msrb.mxu0 %vm548_vm0, %v358_v56  ;;  %v433_v56 = vld [vmem:[%s2318_s19 + $0x68] sm:$0xff] }
  0x91   : > { %1684 = vmatpush.xpose.msk.msrb.mxu1 %vm548_vm0, %v374_v57  ;;  %v466_v57 = vld [vmem:[%s2318_s19 + $0x170] sm:$0xff] }
  0x92   : > { %1701 = vmatpush.xpose.msk.msrb.mxu2 %vm548_vm0, %v390_v58  ;;  %v465_v58 = vld [vmem:[%s2318_s19 + $0x168] sm:$0xff] }
  0x93   : > { %1718 = vmatpush.xpose.msk.msrb.mxu3 %vm548_vm0, %v406_v59 }
  0x94   : > { %1668 = vmatpush.xpose.msk.msrb.mxu0 %vm548_vm0, %v357_v60  ;;  %v432_v60 = vld [vmem:[%s2318_s19 + $0x60] sm:$0xff] }
  0x95   : > { %1685 = vmatpush.xpose.msk.msrb.mxu1 %vm548_vm0, %v373_v61  ;;  %v451_v61 = vld [vmem:[%s2318_s19 + $0xf8] sm:$0xff] }
  0x96   : > { %1702 = vmatpush.xpose.msk.msrb.mxu2 %vm548_vm0, %v389_v63  ;;  %v483_v63 = vld [vmem:[%s2318_s19 + $0x1f8] sm:$0xff] }
  0x97   : > { %1719 = vmatpush.xpose.msk.msrb.mxu3 %vm548_vm0, %v405_v0 }
  0x98   : > { %1669 = vmatpush.xpose.msk.msrb.mxu0 %vm548_vm0, %v356_v1  ;;  %v464_v1 = vld [vmem:[%s2318_s19 + $0x160] sm:$0xff] }
  0x99   : > { %1686 = vmatpush.xpose.msk.msrb.mxu1 %vm548_vm0, %v372_v2  ;;  %v450_v2 = vld [vmem:[%s2318_s19 + $0xf0] sm:$0xff] }
  0x9a   : > { %1703 = vmatpush.xpose.msk.msrb.mxu2 %vm548_vm0, %v388_v3  ;;  %v431_v3 = vld [vmem:[%s2318_s19 + $0x58] sm:$0xff] }
  0x9b   : > { %1670 = vmatmul.msk.f32.vlgmr.msrb.gmra.mxu0 %vm548_vm0, %v288_v4  ;;  %1720 = vmatpush.xpose.msk.msrb.mxu3 %vm548_vm0, %v404_v7  ;;  %v482_v4 = vld [vmem:[%s2318_s19 + $0x1f0] sm:$0xff]  ;;  %v463_v7 = vld [vmem:[%s2318_s19 + $0x158] sm:$0xff] }
  0x9c   : > { %1687 = vmatmul.msk.f32.vlgmr.msrb.gmra.mxu1 %vm548_vm0, %v289_v5  ;;  %1207 = vmatpush.msra.mxu0 %v435_v53  ;;  %v449_v5 = vld [vmem:[%s2318_s19 + $0xe8] sm:$0xff]  ;;  %v444_v53 = vld [vmem:[%s2318_s19 + $0xc0] sm:$0xff] }
  0x9d   : > { %1704 = vmatmul.msk.f32.vlgmr.msrb.gmra.mxu2 %vm548_vm0, %v290_v6  ;;  %1227 = vmatpush.msra.mxu1 %v451_v61  ;;  %v454_v61 = vld [vmem:[%s2318_s19 + $0x110] sm:$0xff] }
  0x9e   : > { %1721 = vmatmul.msk.f32.vlgmr.msrb.gmra.mxu3 %vm548_vm0, %v291_v8  ;;  %1247 = vmatpush.msra.mxu2 %v467_v55  ;;  %v481_v8 = vld [vmem:[%s2318_s19 + $0x1e8] sm:$0xff]  ;;  %v476_v55 = vld [vmem:[%s2318_s19 + $0x1c0] sm:$0xff] }
  0x9f   : > { %1208 = vmatpush.msra.mxu0 %v434_v54  ;;  %1267 = vmatpush.msra.mxu3 %v483_v63  ;;  %v456_v54 = vld [vmem:[%s2318_s19 + $0x120] sm:$0xff]  ;;  %v474_v63 = vld [vmem:[%s2318_s19 + $0x1b0] sm:$0xff] }
  0xa0   : > { %1248 = vmatpush.msra.mxu2 %v466_v57  ;;  %1228 = vmatpush.msra.mxu1 %v450_v2  ;;  %v443_v57 = vld [vmem:[%s2318_s19 + $0xb8] sm:$0xff]  ;;  %v473_v2 = vld [vmem:[%s2318_s19 + $0x1a8] sm:$0xff] }
  0xa1   : > { %1209 = vmatpush.msra.mxu0 %v433_v56  ;;  %1268 = vmatpush.msra.mxu3 %v482_v4  ;;  %v420_v56 = vld [vmem:[%s2318_s19] sm:$0xff] }
  0xa2   : > { %1249 = vmatpush.msra.mxu2 %v465_v58  ;;  %1229 = vmatpush.msra.mxu1 %v449_v5  ;;  %v455_v58 = vld [vmem:[%s2318_s19 + $0x118] sm:$0xff]  ;;  %v452_v4 = vld [vmem:[%s2318_s19 + $0x100] sm:$0xff] }
  0xa3   : > { %1210 = vmatpush.msra.mxu0 %v432_v60  ;;  %1269 = vmatpush.msra.mxu3 %v481_v8  ;;  %v442_v60 = vld [vmem:[%s2318_s19 + $0xb0] sm:$0xff]  ;;  %v472_v5 = vld [vmem:[%s2318_s19 + $0x1a0] sm:$0xff] }
  0xa4   : > { %1250 = vmatpush.msra.mxu2 %v464_v1  ;;  %v453_v1 = vld [vmem:[%s2318_s19 + $0x108] sm:$0xff]  ;;  %v438_v8 = vld [vmem:[%s2318_s19 + $0x90] sm:$0xff] }
  0xa5   : > { %1211 = vmatpush.msra.mxu0 %v431_v3  ;;  %v440_v3 = vld [vmem:[%s2318_s19 + $0xa0] sm:$0xff] }
  0xa6   : > { %1251 = vmatpush.msra.mxu2 %v463_v7  ;;  %v471_v7 = vld [vmem:[%s2318_s19 + $0x198] sm:$0xff] }
  0xd8   : > { %v616_v10 = vpop.f32.mrf.mxu0 }
  0xd9   : > { %v1110_v11 = vmul.f32 %v1109_v9, %v616_v10  ;;  %v686_v12 = vpop.f32.mrf.mxu1  ;;  %v448_v10 = vld [vmem:[%s2318_s19 + $0xe0] sm:$0xff] }
  0xda   : > { %v1111_v62 = vmul.f32 %v1109_v9, %v686_v12  ;;  %v480_v12 = vld [vmem:[%s2318_s19 + $0x1e0] sm:$0xff]  ;;  %1230 = vmatpush.msra.mxu1 %v448_v10  ;;  %v437_v10 = vld [vmem:[%s2318_s19 + $0x88] sm:$0xff] }
  0xdb   : > { %v1119_v13 = vsel %vm1118_vm1, %v1110_v11, -inf  ;;  %1270 = vmatpush.msra.mxu3 %v480_v12  ;;  %v436_v12 = vld [vmem:[%s2318_s19 + $0x80] sm:$0xff] }
  0xdc   : > { %1120 = vmax.xlane.f32.xlu1 %v1119_v13  ;;  %v1122_v16 = vsel %vm1118_vm1, %v1111_v62, -inf  ;;  %v429_v13 = vld [vmem:[%s2318_s19 + $0x48] sm:$0xff] }
  0xe0   : > { %v756_v14 = vpop.f32.mrf.mxu2 }
  0xe1   : > { %v1112_v15 = vmul.f32 %v1109_v9, %v756_v14  ;;  %v826_v18 = vpop.f32.mrf.mxu3 }
  0xe2   : > { %v1113_v19 = vmul.f32 %v1109_v9, %v826_v18  ;;  %v460_v18 = vld [vmem:[%s2318_s19 + $0x140] sm:$0xff] }
  0xe3   : > { %v1125_v17 = vsel %vm1118_vm1, %v1112_v15, -inf }
  0xe4   : > { %1126 = vmax.xlane.f32.xlu0 %v1125_v17  ;;  %1123 = vmax.xlane.f32.xlu1 %v1122_v16  ;;  %v1128_v20 = vsel %vm1118_vm1, %v1113_v19, -inf  ;;  %v428_v17 = vld [vmem:[%s2318_s19 + $0x40] sm:$0xff] }
  0xec   : > { %1129 = vmax.xlane.f32.xlu0 %v1128_v20 }
 0x118   : > { %v896_v21 = vpop.f32.mrf.mxu0 }
 0x119   : > { %v2281_v22 = vmul.f32 %v1109_v9, %v896_v21  ;;  %v966_v23 = vpop.f32.mrf.mxu1  ;;  %v427_v21 = vld [vmem:[%s2318_s19 + $0x38] sm:$0xff] }
 0x11a   : > { %v2283_v24 = vmul.f32 %v1109_v9, %v966_v23 }
 0x11b   : > { %v1131_v25 = vsel %vm1118_vm1, %v2281_v22, -inf }
 0x11c   : > { %1132 = vmax.xlane.f32.xlu0 %v1131_v25  ;;  %v1134_v26 = vsel %vm1118_vm1, %v2283_v24, -inf  ;;  %v426_v25 = vld [vmem:[%s2318_s19 + $0x30] sm:$0xff] }
 0x11d   : > { %1135 = vmax.xlane.f32.xlu1 %v1134_v26 }
 0x120   : > { %v1036_v27 = vpop.f32.mrf.mxu2 }
 0x121   : > { %v2289_v28 = vmul.f32 %v1109_v9, %v1036_v27  ;;  %v1106_v29 = vpop.f32.mrf.mxu3  ;;  %v425_v27 = vld [vmem:[%s2318_s19 + $0x28] sm:$0xff] }
 0x122   : > { %v2293_v31 = vmul.f32 %v1109_v9, %v1106_v29  ;;  %v430_v9 = vld [vmem:[%s2318_s19 + $0x50] sm:$0xff] }
 0x123   : > { %v1137_v30 = vsel %vm1118_vm1, %v2289_v28, -inf  ;;  %1212 = vmatpush.msra.mxu0 %v430_v9  ;;  %v470_v9 = vld [vmem:[%s2318_s19 + $0x190] sm:$0xff] }
 0x124   : > { %1138 = vmax.xlane.f32.xlu2 %v1137_v30  ;;  %v1140_v32 = vsel %vm1118_vm1, %v2293_v31, -inf }
 0x125   : > { %1213 = vmatpush.msra.mxu0 %v429_v13  ;;  %v468_v13 = vld [vmem:[%s2318_s19 + $0x180] sm:$0xff] }
 0x127   : > { %1214 = vmatpush.msra.mxu0 %v428_v17  ;;  %v530_v17 = vld [vmem:[%s2318_s19 + $0x370] sm:$0xff] }
 0x129   : > { %1215 = vmatpush.msra.mxu0 %v427_v21  ;;  %v547_v21 = vld [vmem:[%s2318_s19 + $0x3f8] sm:$0xff] }
 0x12b   : > { %1216 = vmatpush.msra.mxu0 %v426_v25  ;;  %v514_v25 = vld [vmem:[%s2318_s19 + $0x2f0] sm:$0xff] }
 0x12c   : > { %1141 = vmax.xlane.f32.xlu2 %v1140_v32 }
 0x12d   : > { %1217 = vmatpush.msra.mxu0 %v425_v27  ;;  %v495_v27 = vld [vmem:[%s2318_s19 + $0x258] sm:$0xff] }
 0x14f   : > { %v1121_v33 = vpop.xlane.xlu1 %1120 }
 0x150   : > { %v1143_v34 = vsub.f32 %v1110_v11, %v1121_v33  ;;  %v462_v11 = vld [vmem:[%s2318_s19 + $0x150] sm:$0xff] }
 0x151   : > { %1252 = vmatpush.msra.mxu2 %v462_v11  ;;  %v469_v11 = vld [vmem:[%s2318_s19 + $0x188] sm:$0xff] }
 0x152   : > { %v1151_v35 = vmul.f32 1.442695, %v1143_v34 }
 0x154   : > { %1774 = vpow2.f32 %v1151_v35 }
 0x157   : > { %v1127_v36 = vpop.xlane.xlu0 %1126  ;;  %v1124_v38 = vpop.xlane.xlu1 %1123 }
 0x158   : > { %v1145_v37 = vsub.f32 %v1112_v15, %v1127_v36  ;;  %v1144_v40 = vsub.f32 %v1111_v62, %v1124_v38  ;;  %v461_v15 = vld [vmem:[%s2318_s19 + $0x148] sm:$0xff]  ;;  %v424_v36 = vld [vmem:[%s2318_s19 + $0x20] sm:$0xff]  ;;  %v459_v38 = vld [vmem:[%s2318_s19 + $0x138] sm:$0xff] }
 0x159   : > { %1253 = vmatpush.msra.mxu2 %v461_v15  ;;  %1218 = vmatpush.msra.mxu0 %v424_v36  ;;  %v531_v15 = vld [vmem:[%s2318_s19 + $0x378] sm:$0xff]  ;;  %v526_v36 = vld [vmem:[%s2318_s19 + $0x350] sm:$0xff] }
 0x15a   : > { %v1155_v39 = vmul.f32 1.442695, %v1145_v37  ;;  %v2297_v41 = vpop.eup %1774  ;;  %v1153_v43 = vmul.f32 1.442695, %v1144_v40  ;;  %v447_v37 = vld [vmem:[%s2318_s19 + $0xd8] sm:$0xff] }
 0x15b   : > { %v1167_v42 = vsel %vm1118_vm1, %v2297_v41, 0.0  ;;  %1254 = vmatpush.msra.mxu2 %v460_v18  ;;  %1231 = vmatpush.msra.mxu1 %v447_v37  ;;  %v423_v40 = vld [vmem:[%s2318_s19 + $0x18] sm:$0xff]  ;;  %v529_v18 = vld [vmem:[%s2318_s19 + $0x368] sm:$0xff]  ;;  %v544_v37 = vld [vmem:[%s2318_s19 + $0x3e0] sm:$0xff] }
 0x15c   : > { %1776 = vpow2.f32 %v1155_v39  ;;  %1168 = vadd.xlane.f32.xlu1 %v1167_v42  ;;  %v479_v39 = vld [vmem:[%s2318_s19 + $0x1d8] sm:$0xff]  ;;  %v446_v42 = vld [vmem:[%s2318_s19 + $0xd0] sm:$0xff]  ;;  %1219 = vmatpush.msra.mxu0 %v423_v40  ;;  %v492_v40 = vld [vmem:[%s2318_s19 + $0x240] sm:$0xff] }
 0x15d   : > { %1778 = vpow2.f32 %v1153_v43  ;;  %1255 = vmatpush.msra.mxu2 %v459_v38  ;;  %1271 = vmatpush.msra.mxu3 %v479_v39  ;;  %v458_v43 = vld [vmem:[%s2318_s19 + $0x130] sm:$0xff]  ;;  %v493_v38 = vld [vmem:[%s2318_s19 + $0x248] sm:$0xff] }
 0x15e   : > { %1232 = vmatpush.msra.mxu1 %v446_v42  ;;  %v525_v39 = vld [vmem:[%s2318_s19 + $0x348] sm:$0xff] }
 0x15f   : > { %v1130_v44 = vpop.xlane.xlu0 %1129  ;;  %1256 = vmatpush.msra.mxu2 %v458_v43 }
 0x160   : > { %v1146_v45 = vsub.f32 %v1113_v19, %v1130_v44  ;;  %v478_v44 = vld [vmem:[%s2318_s19 + $0x1d0] sm:$0xff] }
 0x161   : > { %1272 = vmatpush.msra.mxu3 %v478_v44  ;;  %v524_v44 = vld [vmem:[%s2318_s19 + $0x340] sm:$0xff] }
 0x162   : > { %v2301_v46 = vpop.eup %1776  ;;  %v1157_v47 = vmul.f32 1.442695, %v1146_v45  ;;  %v422_v45 = vld [vmem:[%s2318_s19 + $0x10] sm:$0xff] }
 0x163   : > { %v1173_v48 = vsel %vm1118_vm1, %v2301_v46, 0.0  ;;  %v2305_v49 = vpop.eup %1778  ;;  %1220 = vmatpush.msra.mxu0 %v422_v45 }
 0x164   : > { %1780 = vpow2.f32 %v1157_v47  ;;  %1174 = vadd.xlane.f32.xlu2 %v1173_v48  ;;  %v1170_v52 = vsel %vm1118_vm1, %v2305_v49, 0.0  ;;  %v445_v47 = vld [vmem:[%s2318_s19 + $0xc8] sm:$0xff] }
 0x165   : > { %v457_v48 = vld [vmem:[%s2318_s19 + $0x128] sm:$0xff]  ;;  %1233 = vmatpush.msra.mxu1 %v445_v47  ;;  %v491_v47 = vld [vmem:[%s2318_s19 + $0x238] sm:$0xff] }
 0x166   : > { %1257 = vmatpush.msra.mxu2 %v457_v48  ;;  %v490_v48 = vld [vmem:[%s2318_s19 + $0x230] sm:$0xff] }
 0x167   : > { %1234 = vmatpush.msra.mxu1 %v444_v53 }
 0x168   : > { %1258 = vmatpush.msra.mxu2 %v456_v54 }
 0x169   : > { %1235 = vmatpush.msra.mxu1 %v443_v57 }
 0x16a   : > { %v2307_v50 = vpop.eup %1780  ;;  %1259 = vmatpush.msra.mxu2 %v455_v58 }
 0x16b   : > { %v1176_v51 = vsel %vm1118_vm1, %v2307_v50, 0.0  ;;  %1236 = vmatpush.msra.mxu1 %v442_v60 }
 0x16c   : > { %1177 = vadd.xlane.f32.xlu0 %v1176_v51  ;;  %1171 = vadd.xlane.f32.xlu2 %v1170_v52  ;;  %v477_v51 = vld [vmem:[%s2318_s19 + $0x1c8] sm:$0xff] }
 0x16d   : > { %1273 = vmatpush.msra.mxu3 %v477_v51  ;;  %v421_v52 = vld [vmem:[%s2318_s19 + $0x8] sm:$0xff]  ;;  %1260 = vmatpush.msra.mxu2 %v454_v61 }
 0x16e   : > { %1221 = vmatpush.msra.mxu0 %v421_v52  ;;  %v489_v51 = vld [vmem:[%s2318_s19 + $0x228] sm:$0xff] }
 0x16f   : > { %1274 = vmatpush.msra.mxu3 %v476_v55  ;;  %1261 = vmatpush.msra.mxu2 %v453_v1  ;;  %v487_v1 = vld [vmem:[%s2318_s19 + $0x218] sm:$0xff] }
 0x170   : > { %1222 = vmatpush.msra.mxu0 %v420_v56 }
 0x171   : > { %1262 = vmatpush.msra.mxu2 %v452_v4  ;;  %v542_v4 = vld [vmem:[%s2318_s19 + $0x3d0] sm:$0xff] }
 0x173   : > { %1327 = vmatpush.msrb.mxu2 %v531_v15  ;;  %v539_v15 = vld [vmem:[%s2318_s19 + $0x3b8] sm:$0xff] }
 0x175   : > { %1328 = vmatpush.msrb.mxu2 %v530_v17  ;;  %v518_v17 = vld [vmem:[%s2318_s19 + $0x310] sm:$0xff] }
 0x177   : > { %1329 = vmatpush.msrb.mxu2 %v529_v18  ;;  %v538_v18 = vld [vmem:[%s2318_s19 + $0x3b0] sm:$0xff] }
 0x18f   : > { %v1133_v59 = vpop.xlane.xlu0 %1132 }
 0x190   : > { %v1147_v0 = vsub.f32 %v2281_v22, %v1133_v59  ;;  %v1136_v62 = vpop.xlane.xlu1 %1135  ;;  %v475_v59 = vld [vmem:[%s2318_s19 + $0x1b8] sm:$0xff] }
 0x191   : > { %v1148_v19 = vsub.f32 %v2283_v24, %v1136_v62  ;;  %1275 = vmatpush.msra.mxu3 %v475_v59  ;;  %v499_v62 = vld [vmem:[%s2318_s19 + $0x278] sm:$0xff] }
 0x192   : > { %v1159_v6 = vmul.f32 1.442695, %v1147_v0  ;;  %v441_v0 = vld [vmem:[%s2318_s19 + $0xa8] sm:$0xff]  ;;  %1287 = vmatpush.msrb.mxu0 %v499_v62  ;;  %v507_v62 = vld [vmem:[%s2318_s19 + $0x2b8] sm:$0xff] }
 0x193   : > { %v1161_v26 = vmul.f32 1.442695, %v1148_v19  ;;  %1276 = vmatpush.msra.mxu3 %v474_v63  ;;  %1237 = vmatpush.msra.mxu1 %v441_v0  ;;  %v496_v19 = vld [vmem:[%s2318_s19 + $0x260] sm:$0xff]  ;;  %v511_v63 = vld [vmem:[%s2318_s19 + $0x2d8] sm:$0xff] }
 0x194   : > { %1782 = vpow2.f32 %v1159_v6  ;;  %v439_v6 = vld [vmem:[%s2318_s19 + $0x98] sm:$0xff] }
 0x195   : > { %1277 = vmatpush.msra.mxu3 %v473_v2  ;;  %1238 = vmatpush.msra.mxu1 %v440_v3  ;;  %v543_v0 = vld [vmem:[%s2318_s19 + $0x3d8] sm:$0xff]  ;;  %v510_v2 = vld [vmem:[%s2318_s19 + $0x2d0] sm:$0xff] }
 0x196   : > { %v522_v3 = vld [vmem:[%s2318_s19 + $0x330] sm:$0xff] }
 0x197   : > { %v1139_v14 = vpop.xlane.xlu2 %1138  ;;  %1278 = vmatpush.msra.mxu3 %v472_v5  ;;  %1239 = vmatpush.msra.mxu1 %v439_v6  ;;  %v486_v5 = vld [vmem:[%s2318_s19 + $0x210] sm:$0xff]  ;;  %v509_v6 = vld [vmem:[%s2318_s19 + $0x2c8] sm:$0xff] }
 0x198   : > { %v1149_v16 = vsub.f32 %v2289_v28, %v1139_v14  ;;  %v498_v14 = vld [vmem:[%s2318_s19 + $0x270] sm:$0xff] }
 0x199   : > { %1279 = vmatpush.msra.mxu3 %v471_v7  ;;  %1240 = vmatpush.msra.mxu1 %v438_v8  ;;  %v521_v7 = vld [vmem:[%s2318_s19 + $0x328] sm:$0xff] }
 0x19a   : > { %v1163_v20 = vmul.f32 1.442695, %v1149_v16  ;;  %v2348_v22 = vpop.eup %1782  ;;  %v497_v16 = vld [vmem:[%s2318_s19 + $0x268] sm:$0xff]  ;;  %1288 = vmatpush.msrb.mxu0 %v498_v14  ;;  %v519_v14 = vld [vmem:[%s2318_s19 + $0x318] sm:$0xff] }
 0x19b   : > { %v1179_v23 = vsel %vm1118_vm1, %v2348_v22, 0.0  ;;  %1280 = vmatpush.msra.mxu3 %v470_v9  ;;  %1241 = vmatpush.msra.mxu1 %v437_v10  ;;  %v541_v8 = vld [vmem:[%s2318_s19 + $0x3c8] sm:$0xff]  ;;  %v508_v10 = vld [vmem:[%s2318_s19 + $0x2c0] sm:$0xff] }
 0x19c   : > { %1784 = vpow2.f32 %v1163_v20  ;;  %1180 = vadd.xlane.f32.xlu2 %v1179_v23  ;;  %v515_v20 = vld [vmem:[%s2318_s19 + $0x2f8] sm:$0xff]  ;;  %1289 = vmatpush.msrb.mxu0 %v497_v16  ;;  %v528_v23 = vld [vmem:[%s2318_s19 + $0x360] sm:$0xff]  ;;  %v485_v9 = vld [vmem:[%s2318_s19 + $0x208] sm:$0xff] }
 0x19d   : > { %1786 = vpow2.f32 %v1161_v26  ;;  %1281 = vmatpush.msra.mxu3 %v469_v11  ;;  %1242 = vmatpush.msra.mxu1 %v436_v12  ;;  %v520_v11 = vld [vmem:[%s2318_s19 + $0x320] sm:$0xff]  ;;  %v506_v16 = vld [vmem:[%s2318_s19 + $0x2b0] sm:$0xff] }
 0x19e   : > { %1290 = vmatpush.msrb.mxu0 %v496_v19  ;;  %1330 = vmatpush.msrb.mxu2 %v528_v23  ;;  %v540_v12 = vld [vmem:[%s2318_s19 + $0x3c0] sm:$0xff]  ;;  %v505_v19 = vld [vmem:[%s2318_s19 + $0x2a8] sm:$0xff] }
 0x19f   : > { %v1142_v28 = vpop.xlane.xlu2 %1141  ;;  %1282 = vmatpush.msra.mxu3 %v468_v13  ;;  %1307 = vmatpush.msrb.mxu1 %v515_v20  ;;  %v484_v13 = vld [vmem:[%s2318_s19 + $0x200] sm:$0xff]  ;;  %v517_v20 = vld [vmem:[%s2318_s19 + $0x308] sm:$0xff] }
 0x1a0   : > { %v1150_v24 = vsub.f32 %v2293_v31, %v1142_v28  ;;  %v546_v28 = vld [vmem:[%s2318_s19 + $0x3f0] sm:$0xff]  ;;  %1291 = vmatpush.msrb.mxu0 %v495_v27  ;;  %v504_v23 = vld [vmem:[%s2318_s19 + $0x2a0] sm:$0xff]  ;;  %v503_v27 = vld [vmem:[%s2318_s19 + $0x298] sm:$0xff] }
 0x1a1   : > { %1347 = vmatpush.msrb.mxu3 %v547_v21  ;;  %1308 = vmatpush.msrb.mxu1 %v514_v25  ;;  %v537_v21 = vld [vmem:[%s2318_s19 + $0x3a8] sm:$0xff]  ;;  %v516_v25 = vld [vmem:[%s2318_s19 + $0x300] sm:$0xff] }
 0x1a2   : > { %v2355_v29 = vpop.eup %1784  ;;  %v1165_v30 = vmul.f32 1.442695, %v1150_v24  ;;  %v513_v24 = vld [vmem:[%s2318_s19 + $0x2e8] sm:$0xff] }
 0x1a3   : > { %v1185_v32 = vsel %vm1118_vm1, %v2355_v29, 0.0  ;;  %v2359_v33 = vpop.eup %1786  ;;  %1348 = vmatpush.msrb.mxu3 %v546_v28  ;;  %1309 = vmatpush.msrb.mxu1 %v513_v24  ;;  %v535_v28 = vld [vmem:[%s2318_s19 + $0x398] sm:$0xff]  ;;  %v502_v24 = vld [vmem:[%s2318_s19 + $0x290] sm:$0xff] }
 0x1a4   : > { %1788 = vpow2.f32 %v1165_v30  ;;  %1186 = vadd.xlane.f32.xlu0 %v1185_v32  ;;  %v1182_v35 = vsel %vm1118_vm1, %v2359_v33, 0.0  ;;  %v527_v30 = vld [vmem:[%s2318_s19 + $0x358] sm:$0xff]  ;;  %v545_v32 = vld [vmem:[%s2318_s19 + $0x3e8] sm:$0xff] }
 0x1a5   : > { %1331 = vmatpush.msrb.mxu2 %v527_v30  ;;  %1349 = vmatpush.msrb.mxu3 %v545_v32  ;;  %v534_v30 = vld [vmem:[%s2318_s19 + $0x390] sm:$0xff]  ;;  %v501_v32 = vld [vmem:[%s2318_s19 + $0x288] sm:$0xff] }
 0x1a7   : > { %1332 = vmatpush.msrb.mxu2 %v526_v36  ;;  %1350 = vmatpush.msrb.mxu3 %v544_v37  ;;  %v532_v36 = vld [vmem:[%s2318_s19 + $0x380] sm:$0xff] }
 0x1a9   : > { %1333 = vmatpush.msrb.mxu2 %v525_v39  ;;  %1351 = vmatpush.msrb.mxu3 %v543_v0 }
 0x1aa   : > { %v2361_v34 = vpop.eup %1788 }
 0x1ab   : > { %v1188_v31 = vsel %vm1118_vm1, %v2361_v34, 0.0  ;;  %1334 = vmatpush.msrb.mxu2 %v524_v44  ;;  %1352 = vmatpush.msrb.mxu3 %v542_v4 }
 0x1ac   : > { %1189 = vadd.xlane.f32.xlu1 %v1188_v31  ;;  %1183 = vadd.xlane.f32.xlu0 %v1182_v35  ;;  %v494_v31 = vld [vmem:[%s2318_s19 + $0x250] sm:$0xff]  ;;  %v512_v35 = vld [vmem:[%s2318_s19 + $0x2e0] sm:$0xff] }
 0x1ad   : > { %1292 = vmatpush.msrb.mxu0 %v494_v31  ;;  %1310 = vmatpush.msrb.mxu1 %v512_v35  ;;  %v533_v31 = vld [vmem:[%s2318_s19 + $0x388] sm:$0xff]  ;;  %v500_v35 = vld [vmem:[%s2318_s19 + $0x280] sm:$0xff] }
 0x1ae   : > { %1353 = vmatpush.msrb.mxu3 %v541_v8 }
 0x1af   : > { %1293 = vmatpush.msrb.mxu0 %v493_v38  ;;  %1311 = vmatpush.msrb.mxu1 %v511_v63 }
 0x1b0   : > { %1354 = vmatpush.msrb.mxu3 %v540_v12 }
 0x1b1   : > { %1294 = vmatpush.msrb.mxu0 %v492_v40  ;;  %1312 = vmatpush.msrb.mxu1 %v510_v2 }
 0x1b2   : > { %1355 = vmatpush.msrb.mxu3 %v539_v15 }
 0x1b3   : > { %1295 = vmatpush.msrb.mxu0 %v491_v47  ;;  %1313 = vmatpush.msrb.mxu1 %v509_v6 }
 0x1b4   : > { %1356 = vmatpush.msrb.mxu3 %v538_v18 }
 0x1b5   : > { %1296 = vmatpush.msrb.mxu0 %v490_v48  ;;  %1314 = vmatpush.msrb.mxu1 %v508_v10 }
 0x1b6   : > { %1357 = vmatpush.msrb.mxu3 %v537_v21 }
 0x1b7   : > { %1297 = vmatpush.msrb.mxu0 %v489_v51  ;;  %1315 = vmatpush.msrb.mxu1 %v507_v62 }
 0x1b9   : > { %1316 = vmatpush.msrb.mxu1 %v506_v16 }
 0x1bb   : > { %1317 = vmatpush.msrb.mxu1 %v505_v19 }
 0x1bd   : > { %1318 = vmatpush.msrb.mxu1 %v504_v23 }
 0x1bf   : > { %1319 = vmatpush.msrb.mxu1 %v503_v27 }
 0x1c1   : > { %1320 = vmatpush.msrb.mxu1 %v502_v24 }
 0x1c3   : > { %1321 = vmatpush.msrb.mxu1 %v501_v32 }
 0x1c5   : > { %1322 = vmatpush.msrb.mxu1 %v500_v35 }
 0x1cf   : > { %v1169_v26 = vpop.xlane.xlu1 %1168 }
 0x1d0   : > { %1790 = vrcp.f32 %v1169_v26  ;;  %v536_v26 = vld [vmem:[%s2318_s19 + $0x3a0] sm:$0xff] }
 0x1d1   : > { %1358 = vmatpush.msrb.mxu3 %v536_v26 }
 0x1d3   : > { %1359 = vmatpush.msrb.mxu3 %v535_v28 }
 0x1d5   : > { %1360 = vmatpush.msrb.mxu3 %v534_v30 }
 0x1d6   : > { %v1791_v42 = vpop.eup %1790 }
 0x1d7   : > { %v1175_v43 = vpop.xlane.xlu2 %1174  ;;  %v1199_v45 = vmul.f32 %v1791_v42, %v2297_v41  ;;  %1361 = vmatpush.msrb.mxu3 %v533_v31 }
 0x1d8   : > { %1792 = vrcp.f32 %v1175_v43 }
 0x1d9   : > { %1223 = vmatmul.f32.vlgmr.msra.gmra.mxu0 %v1199_v45  ;;  %1362 = vmatpush.msrb.mxu3 %v532_v36 }
 0x1de   : > { %v1793_v52 = vpop.eup %1792 }
 0x1df   : > { %v1178_v53 = vpop.xlane.xlu0 %1177  ;;  %v1172_v54 = vpop.xlane.xlu2 %1171  ;;  %v1201_v55 = vmul.f32 %v1793_v52, %v2301_v46 }
 0x1e0   : > { %1794 = vrcp.f32 %v1178_v53 }
 0x1e1   : > { %1796 = vrcp.f32 %v1172_v54  ;;  %1263 = vmatmul.f32.vlgmr.msra.gmra.mxu2 %v1201_v55  ;;  %v1408_v59 = vrot.slane %v1201_v55, 6 }
 0x1e6   : > { %v1795_v41 = vpop.eup %1794 }
 0x1e7   : > { %v1797_v56 = vpop.eup %1796  ;;  %v2434_v57 = vmul.f32 %v1795_v41, %v2307_v50  ;;  %v488_v50 = vld [vmem:[%s2318_s19 + $0x220] sm:$0xff] }
 0x1e8   : > { %v1200_v58 = vmul.f32 %v1797_v56, %v2305_v49  ;;  %v523_v49 = vld [vmem:[%s2318_s19 + $0x338] sm:$0xff]  ;;  %1298 = vmatpush.msrb.mxu0 %v488_v50 }
 0x1e9   : > { %1283 = vmatmul.f32.vlgmr.msra.gmra.mxu3 %v2434_v57  ;;  %1335 = vmatpush.msrb.mxu2 %v523_v49  ;;  %v1410_v52 = vrot.slane %v2434_v57, 5 }
 0x1ea   : > { %1243 = vmatmul.f32.vlgmr.msra.gmra.mxu1 %v1200_v58  ;;  %v1406_v46 = vrot.slane %v1200_v58, 7  ;;  %1299 = vmatpush.msrb.mxu0 %v487_v1 }
 0x1eb   : > { %1336 = vmatpush.msrb.mxu2 %v522_v3 }
 0x1ec   : > { %v1407_v60 = vsel %vm1376_vm2, %v1406_v46, %v1199_v45  ;;  %1300 = vmatpush.msrb.mxu0 %v486_v5 }
 0x1ed   : > { %v2440_v61 = vsel %vm1379_vm3, %v1408_v59, %v1407_v60  ;;  %1337 = vmatpush.msrb.mxu2 %v521_v7 }
 0x1ee   : > { %1301 = vmatpush.msrb.mxu0 %v485_v9  ;;  %v1411_v54 = vsel %vm1382_vm4, %v1410_v52, %v2440_v61 }
 0x1ef   : > { %1338 = vmatpush.msrb.mxu2 %v520_v11 }
 0x1f0   : > { %1302 = vmatpush.msrb.mxu0 %v484_v13 }
 0x1f1   : > { %1339 = vmatpush.msrb.mxu2 %v519_v14 }
 0x1f3   : > { %1340 = vmatpush.msrb.mxu2 %v518_v17 }
 0x1f5   : > { %1341 = vmatpush.msrb.mxu2 %v517_v20 }
 0x1f7   : > { %1342 = vmatpush.msrb.mxu2 %v516_v25 }
 0x20f   : > { %v1181_v37 = vpop.xlane.xlu2 %1180 }
 0x210   : > { %1798 = vrcp.f32 %v1181_v37 }
 0x216   : > { %v1799_v38 = vpop.eup %1798 }
 0x217   : > { %v1187_v39 = vpop.xlane.xlu0 %1186  ;;  %v1203_v40 = vmul.f32 %v1799_v38, %v2348_v22 }
 0x218   : > { %1800 = vrcp.f32 %v1187_v39 }
 0x219   : > { %1303 = vmatmul.f32.vlgmr.msrb.gmra.mxu0 %v1203_v40  ;;  %v1412_v48 = vrot.slane %v1203_v40, 4 }
 0x21b   : > { %v1413_v41 = vsel %vm1385_vm5, %v1412_v48, %v1411_v54 }
 0x21e   : > { %v1801_v42 = vpop.eup %1800 }
 0x21f   : > { %v1184_v43 = vpop.xlane.xlu0 %1183  ;;  %v1190_v44 = vpop.xlane.xlu1 %1189  ;;  %v1205_v45 = vmul.f32 %v1801_v42, %v2355_v29 }
 0x220   : > { %1802 = vrcp.f32 %v1184_v43 }
 0x221   : > { %1804 = vrcp.f32 %v1190_v44  ;;  %1343 = vmatmul.f32.vlgmr.msrb.gmra.mxu2 %v1205_v45  ;;  %v1416_v55 = vrot.slane %v1205_v45, 2 }
 0x226   : > { %v1803_v47 = vpop.eup %1802 }
 0x227   : > { %v1805_v51 = vpop.eup %1804  ;;  %v1204_v22 = vmul.f32 %v1803_v47, %v2359_v33 }
 0x228   : > { %v1206_v53 = vmul.f32 %v1805_v51, %v2361_v34 }
 0x229   : > { %v1414_v29 = vrot.slane %v1204_v22, 3  ;;  %1323 = vmatmul.f32.vlgmr.msrb.gmra.mxu1 %v1204_v22 }
 0x22a   : > { %1363 = vmatmul.f32.vlgmr.msrb.gmra.mxu3 %v1206_v53  ;;  %v1418_v33 = vrot.slane %v1206_v53, 1 }
 0x22b   : > { %v1415_v56 = vsel %vm1388_vm6, %v1414_v29, %v1413_v41 }
 0x22c   : > { %v1417_v34 = vsel %vm1391_vm7, %v1416_v55, %v1415_v56 }
 0x22d   : > { %v1419_v57 = vsel %vm1394_vm8, %v1418_v33, %v1417_v34 }
 0x22e   : > { %1421 = vst [vmem:[%s263_s26] sm:$0xff] %v1419_v57 }
 0x22f   : > { %1833 = shalt.err (!%p1830_p4)
}
 0x230   : > { %1731 = dma.vmem_to_hbm [thread:$0]  (%p1973_p5), %s1455_s9, 128, %s1457_s10, %s1428_s11  }
 0x231   : > { %s1438_s27 = scalar_lea.hbm %s2556_s4, %s1984_s6  ;;  %s256_s7 = scalar_lea.vmem [#allocation3], %s1577_s24 }
 0x232   : > { %s1440_s8 = sshll.u32 %s256_s7, 4  ;;  %s1442_s9 = sshll.u32 %s1438_s27, 4  ;;  %s1441_s8 = int_to_ptr.vmem [resolvable:$true] %s1440_s8  ;;  %s1443_s9 = int_to_ptr.hbm [resolvable:$true] %s1442_s9 }
 0x233   : > { %s1423_s6 = scalar_lea.sflag [#allocation4], %s2482_s0  ;;  %s1848_s10 = sshra.s32 %s1443_s9, 4  ;;  %s1849_s10 = int_to_ptr.hbm [resolvable:$true] %s1848_s10 }
 0x234   : > { %s1850_s11 = scalar_lea.hbm %s1849_s10, 8  ;;  %s1854_s13 = scalar_lea.hbm %s2556_s4, 16 }
 0x235   : > { %p1851_p7 = scmp.ne.s32.totalorder %s1849_s10, %s1850_s11  ;;  %p1855_p10 = scmp.lt.s32.totalorder %s1849_s10, %s2556_s4 }
 0x236   : > { %p1856_p11 = scmp.lt.s32.totalorder %s1854_s13, %s1850_s11 }
 0x237   : > { %p1852_p8 = pnand %p1851_p7, %p1973_p5 }
 0x238   : > { %p1857_p12 = por %p1856_p11, %p1855_p10 }
 0x239   : > { %p1853_p9 = pneg %p1852_p8 }
 0x23b   : > { %p1858_p13 = pnand %p1857_p12, %p1853_p9 }
 0x256   : > { %v1224_v58 = vpop.f32.mrf.mxu0 }
 0x264   : > { %v1264_v59 = vpop.f32.mrf.mxu2 }
 0x265   : > { %v1378_v1 = vrot.slane %v1264_v59, 6 }
 0x267   : > { %v1244_v46 = vpop.f32.mrf.mxu1 }
 0x268   : > { %v1375_v60 = vrot.slane %v1244_v46, 7 }
 0x26a   : > { %v1377_v63 = vsel %vm1376_vm2, %v1375_v60, %v1224_v58 }
 0x26b   : > { %v1380_v4 = vsel %vm1379_vm3, %v1378_v1, %v1377_v63 }
 0x26c   : > { %v1284_v61 = vpop.f32.mrf.mxu3 }
 0x26d   : > { %v1381_v49 = vrot.slane %v1284_v61, 5 }
 0x26f   : > { %v1383_v5 = vsel %vm1382_vm4, %v1381_v49, %v1380_v4 }
 0x296   : > { %v1304_v50 = vpop.f32.mrf.mxu0 }
 0x297   : > { %v1384_v2 = vrot.slane %v1304_v50, 4 }
 0x299   : > { %v1386_v7 = vsel %vm1385_vm5, %v1384_v2, %v1383_v5 }
 0x2a4   : > { %v1344_v6 = vpop.f32.mrf.mxu2 }
 0x2a5   : > { %v1390_v9 = vrot.slane %v1344_v6, 2 }
 0x2a6   : > { %v1324_v0 = vpop.f32.mrf.mxu1 }
 0x2a7   : > { %v1387_v3 = vrot.slane %v1324_v0, 3 }
 0x2a9   : > { %v1389_v8 = vsel %vm1388_vm6, %v1387_v3, %v1386_v7 }
 0x2aa   : > { %v1392_v12 = vsel %vm1391_vm7, %v1390_v9, %v1389_v8 }
 0x2ad   : > { %v1364_v10 = vpop.f32.mrf.mxu3 }
 0x2ae   : > { %v1393_v11 = vrot.slane %v1364_v10, 1 }
 0x2b0   : > { %v1395_v13 = vsel %vm1394_vm8, %v1393_v11, %v1392_v12 }
 0x2b1   : > { %1397 = vst [vmem:[%s256_s7] sm:$0xff] %v1395_v13 }
 0x2b2   : > { %1861 = shalt.err (!%p1858_p13)
}
 0x2b3   : > { %1730 = dma.vmem_to_hbm [thread:$0]  (%p1973_p5), %s1441_s8, 128, %s1443_s9, %s1423_s6  }
 0x2b4 PF: > { %p1741_p0 = scmp.ge.s32.totalorder %s1900_s23, 2  ;;  %s1468_s0 = sand.u32 1, %s1888_s20  }
 0x2b5   : > { %s1469_s16 = scalar_lea.sflag [#allocation4], %s1468_s0 }
 0x2b6   : > { %p1735_p1 = pnand %p1741_p0, %p1977_p6 }
 0x2b8   : > { %p1736_p2 = pneg %p1735_p1 }
 0x2ba   : > { %1879 = dma.done.wait (%p1736_p2), %s1469_s16, 128  }
 0x2bb   : > { %1881 = vsyncadd (%p1736_p2), %s1469_s16, 4294967168  ;;  %s1479_s17 = scalar_lea.sflag [#allocation6], %s1468_s0 }
 0x2bc   : > { %1883 = dma.done.wait (%p1736_p2), %s1479_s17, 128  }
 0x2bd   : > { %1885 = vsyncadd (%p1736_p2), %s1479_s17, 4294967168  ;;  %p20_p5 = scmp.ge.s32.totalorder %s1960_s25, 4   ;;  %s2560_s20 = smov %s1892_s21 }
 0x2be   : > { %s2561_s21 = smov %s1896_s22  ;;  %s2562_s22 = smov %s1971_s28 }
 0x2bf   : > { %s2563_s23 = smov %s1960_s25  ;;  %22 = sbr.rel (!%p20_p5) target bundleno = 7 (0x7), region = 94 }
 0x2c4   :  { %1485 = vsyncpa [#allocation4], 1 }
 0x2c5   :  { %1487 = vsyncpa [#allocation4 + $0x1], 1 }
 0x2c6   :  { %1488 = vsyncpa [#allocation6], 1 }
 0x2c7   :  { %1490 = vsyncpa [#allocation6 + $0x1], 1 }

</bundles_post_ra>
